<compile_context>
chip_gen: v7x
topology: tpu7x:2x2x1
jax: 0.10.0
libtpu: 0.0.40
codegen_flags: <defaults>
</compile_context>

<pallas_src>
import functools

import jax
import jax.numpy as jnp
from jax.experimental import pallas as pl
from jax.experimental.pallas import tpu as pltpu


def _round_up(x, m):
    return (x + m - 1) // m * m


@functools.lru_cache(maxsize=1)
def _vmem_capacity_bytes():
    try:
        return int(pltpu.get_tpu_info().vmem_capacity_bytes)
    except Exception:
        return 64 * 1024 * 1024  # conservative (v7x-sized) fallback


# --------------------------------------------------------------------------
# Kernels
# --------------------------------------------------------------------------
def _ffn_fused_kernel(x_ref, w1_ref, b1_ref, w2_ref, b2_ref, o_ref):
    # Weights fully VMEM-resident; one fused matmul-relu-matmul per M tile.
    h = jnp.dot(x_ref[...], w1_ref[...], preferred_element_type=jnp.float32)
    h = jnp.maximum(h + b1_ref[...].astype(jnp.float32), 0.0)
    out = jnp.dot(h.astype(w2_ref.dtype), w2_ref[...],
                  preferred_element_type=jnp.float32)
    o_ref[...] = (out + b2_ref[...].astype(jnp.float32)).astype(o_ref.dtype)


def _ffn_tiled_kernel(x_ref, w1_ref, b1_ref, w2_ref, b2_ref, o_ref, acc_ref):
    # x_ref : (bm, Cp)   w1_ref: (Cp, bh)   b1_ref: (1, bh)
    # w2_ref: (bh, Cp)   b2_ref: (1, Cp)    o_ref : (bm, Cp)
    # acc_ref: (bm, Cp) f32 scratch, resident across the inner H axis.
    j = pl.program_id(1)

    h = jnp.dot(x_ref[...], w1_ref[...], preferred_element_type=jnp.float32)
    h = jnp.maximum(h + b1_ref[...].astype(jnp.float32), 0.0)
    contrib = jnp.dot(h.astype(w2_ref.dtype), w2_ref[...],
                      preferred_element_type=jnp.float32)

    @pl.when(j == 0)
    def _first():
        acc_ref[...] = contrib          # write, don't zero-init + add

    @pl.when(j > 0)
    def _rest():
        acc_ref[...] += contrib

    @pl.when(j == pl.num_programs(1) - 1)
    def _finalize():
        o_ref[...] = (acc_ref[...] + b2_ref[...].astype(jnp.float32)).astype(
            o_ref.dtype)


# --------------------------------------------------------------------------
# Wrapper
# --------------------------------------------------------------------------
@functools.partial(jax.jit, static_argnames=("block_m", "block_h"))
def feed_forward(x, w1, b1, w2, b2, block_m=None, block_h=None):
    """x: [B, T, C];  w1: [C, H];  b1: [H];  w2: [H, C];  b2: [C] (H = 4*C)."""
    B, T, C = x.shape
    Cin, H = w1.shape
    assert Cin == C and w2.shape == (H, C) and b1.shape == (H,) and b2.shape == (C,)

    dtype = x.dtype
    isz = jnp.dtype(dtype).itemsize
    sublane = 16 if dtype == jnp.bfloat16 else 8

    M = B * T
    C_pad = _round_up(C, 128)
    H_pad_full = _round_up(H, 128)

    vmem_cap = _vmem_capacity_bytes()
    budget_cap = int(vmem_cap * 0.7)          # leave headroom for the compiler

    # Per-generation row-tile target: big enough that (tiled-path) weight
    # re-streaming per M tile stays above the HBM roofline; smaller on v7x
    # because of its 64 MiB VMEM.
    bm_target = block_m if block_m is not None else (
        512 if vmem_cap <= 64 * 1024 * 1024 else 1024)

    def _balanced(total, tile, align):
        """Balanced tiling: tile size aligned, waste < one tile of padding."""
        tile = max(align, min(_round_up(tile, align), _round_up(total, align)))
        n = pl.cdiv(total, tile)
        tile = _round_up(pl.cdiv(total, n), align)
        return n, tile

    n_m, bm = _balanced(M, bm_target, sublane)
    if M >= 2 * sublane and n_m < 2:
        # Give the "parallel" M axis >= 2 tiles so v7x megacore can shard it.
        n_m, bm = _balanced(M, _round_up(pl.cdiv(M, 2), sublane), sublane)

    def _fused_budget(bm_):
        return (2 * bm_ * C_pad * isz                 # x tile (double buffered)
                + 2 * C_pad * H_pad_full * isz        # W1 (resident)
                + 2 * H_pad_full * C_pad * isz        # W2 (resident)
                + 2 * (H_pad_full + C_pad) * isz      # biases
                + 2 * bm_ * C_pad * isz               # out tile
                + bm_ * H_pad_full * 4                # f32 hidden intermediate
                + bm_ * C_pad * 4)                    # f32 output intermediate

    use_fast = (block_h is None or block_h >= H) and _fused_budget(bm) <= budget_cap

    if use_fast:
        H_pad = H_pad_full
        bh = H_pad
        n_h = 1
        budget = _fused_budget(bm)
    else:
        bh_target = block_h if block_h is not None else min(1024, H_pad_full)
        n_h, bh = _balanced(H, bh_target, 128)

        def _tiled_budget(bm_, bh_):
            return (2 * bm_ * C_pad * isz             # x tile
                    + 2 * C_pad * bh_ * isz           # W1 slab
                    + 2 * bh_ * C_pad * isz           # W2 slab
                    + 2 * (bh_ + C_pad) * isz         # biases
                    + 2 * bm_ * C_pad * isz           # out tile
                    + bm_ * C_pad * 4                 # f32 accumulator
                    + bm_ * bh_ * 4)                  # f32 hidden intermediate

        # Shrink tiles until the working set fits the per-generation VMEM.
        while _tiled_budget(bm, bh) > budget_cap and (bh > 128 or bm > sublane):
            if bh > 128:
                bh = max(128, (bh // 2) // 128 * 128)
            else:
                bm = max(sublane, (bm // 2) // sublane * sublane)
        n_h = pl.cdiv(H, bh)
        n_m = pl.cdiv(M, bm)
        budget = _tiled_budget(bm, bh)

    M_pad = n_m * bm
    H_pad = n_h * bh

    # --- padding (skipped when shapes are already aligned) ------------------
    x2 = x.reshape(M, C)
    if M_pad != M or C_pad != C:
        x2 = jnp.pad(x2, ((0, M_pad - M), (0, C_pad - C)))
    # TODO(synk): in production, pre-pad W1/W2/b1/b2 once at parameter load
    # instead of on every forward call.
    w1p = jnp.pad(w1, ((0, C_pad - C), (0, H_pad - H))) if (C_pad != C or H_pad != H) else w1
    w2p = jnp.pad(w2, ((0, H_pad - H), (0, C_pad - C))) if (C_pad != C or H_pad != H) else w2
    b1p = (jnp.pad(b1, (0, H_pad - H)) if H_pad != H else b1).reshape(1, H_pad)
    b2p = (jnp.pad(b2, (0, C_pad - C)) if C_pad != C else b2).reshape(1, C_pad)

    vmem_limit = int(min(max(int(budget * 1.5), 32 * 1024 * 1024),
                         int(vmem_cap * 0.9)))
    vmem_limit = max(vmem_limit, int(budget))

    weight_reads = 1 if use_fast else n_m
    cost = pl.CostEstimate(
        flops=4 * M_pad * C_pad * H_pad,              # two matmuls
        transcendentals=0,
        bytes_accessed=int(
            M_pad * C_pad * isz                        # x read
            + M_pad * C_pad * isz                      # out write
            + weight_reads * (2 * C_pad * H_pad * isz  # W1 + W2 (re-)reads
                              + (H_pad + C_pad) * isz)),
    )

    if use_fast:
        out2 = pl.pallas_call(
            _ffn_fused_kernel,
            out_shape=jax.ShapeDtypeStruct((M_pad, C_pad), dtype),
            grid_spec=pltpu.PrefetchScalarGridSpec(
                num_scalar_prefetch=0,
                grid=(n_m,),
                in_specs=[
                    pl.BlockSpec((bm, C_pad), lambda i: (i, 0)),      # x rows
                    pl.BlockSpec((C_pad, H_pad), lambda i: (0, 0)),   # W1 (resident)
                    pl.BlockSpec((1, H_pad), lambda i: (0, 0)),       # b1
                    pl.BlockSpec((H_pad, C_pad), lambda i: (0, 0)),   # W2 (resident)
                    pl.BlockSpec((1, C_pad), lambda i: (0, 0)),       # b2
                ],
                out_specs=pl.BlockSpec((bm, C_pad), lambda i: (i, 0)),
            ),
            compiler_params=pltpu.CompilerParams(
                dimension_semantics=("parallel",),
                vmem_limit_bytes=vmem_limit,
            ),
            cost_estimate=cost,
        )(x2, w1p, b1p, w2p, b2p)
    else:
        out2 = pl.pallas_call(
            _ffn_tiled_kernel,
            out_shape=jax.ShapeDtypeStruct((M_pad, C_pad), dtype),
            grid_spec=pltpu.PrefetchScalarGridSpec(
                num_scalar_prefetch=0,
                grid=(n_m, n_h),
                in_specs=[
                    pl.BlockSpec((bm, C_pad), lambda i, j: (i, 0)),   # x rows
                    pl.BlockSpec((C_pad, bh), lambda i, j: (0, j)),   # W1[:, j]
                    pl.BlockSpec((1, bh), lambda i, j: (0, j)),       # b1[j]
                    pl.BlockSpec((bh, C_pad), lambda i, j: (j, 0)),   # W2[j, :]
                    pl.BlockSpec((1, C_pad), lambda i, j: (0, 0)),    # b2
                ],
                out_specs=pl.BlockSpec((bm, C_pad), lambda i, j: (i, 0)),
                scratch_shapes=[pltpu.VMEM((bm, C_pad), jnp.float32)],
            ),
            compiler_params=pltpu.CompilerParams(
                dimension_semantics=("parallel", "arbitrary"),
                vmem_limit_bytes=vmem_limit,
            ),
            cost_estimate=cost,
        )(x2, w1p, b1p, w2p, b2p)

    return out2[:M, :C].reshape(B, T, C)


# --------------------------------------------------------------------------
# Reference + tests
# --------------------------------------------------------------------------
def _reference(x, w1, b1, w2, b2):
    h = jnp.maximum(x @ w1 + b1, 0.0)
    return h @ w2 + b2


def _make_params(key, C, H, dtype):
    k1, k2, k3, k4 = jax.random.split(key, 4)
    bound1 = 1.0 / (C ** 0.5)
    bound2 = 1.0 / (H ** 0.5)
    w1 = jax.random.uniform(k1, (C, H), jnp.float32, -bound1, bound1).astype(dtype)
    b1 = jax.random.uniform(k2, (H,), jnp.float32, -bound1, bound1).astype(dtype)
    w2 = jax.random.uniform(k3, (H, C), jnp.float32, -bound2, bound2).astype(dtype)
    b2 = jax.random.uniform(k4, (C,), jnp.float32, -bound2, bound2).astype(dtype)
    return w1, b1, w2, b2


if __name__ == "__main__":
    key = jax.random.PRNGKey(0)

    # --- small shapes consistent with the module (n_embd = 32, hidden = 128) ---
    B, T, C = 2, 8, 32
    H = 4 * C
    kx, kp = jax.random.split(key)
    x = jax.random.normal(kx, (B, T, C), dtype=jnp.float32)
    w1, b1, w2, b2 = _make_params(kp, C, H, jnp.float32)

    out = jax.block_until_ready(feed_forward(x, w1, b1, w2, b2))
    ref = _reference(x, w1, b1, w2, b2)
    assert out.shape == (B, T, C)
    assert jnp.allclose(out, ref, atol=1e-4, rtol=1e-4), "f32 small mismatch"

    # --- larger shape: weight-resident fast path with >= 2 parallel M tiles ---
    B2, T2, C2 = 2, 256, 256
    H2 = 4 * C2
    kx2, kp2 = jax.random.split(jax.random.PRNGKey(1))
    x_l = jax.random.normal(kx2, (B2, T2, C2), dtype=jnp.float32)
    w1l, b1l, w2l, b2l = _make_params(kp2, C2, H2, jnp.float32)
    out_l = jax.block_until_ready(feed_forward(x_l, w1l, b1l, w2l, b2l))
    ref_l = _reference(x_l, w1l, b1l, w2l, b2l)
    assert jnp.allclose(out_l, ref_l, atol=5e-3, rtol=5e-3), "f32 large mismatch"

    # --- force the tiled (H-streaming, accumulate) path to exercise it ---
    out_t = jax.block_until_ready(
        feed_forward(x_l, w1l, b1l, w2l, b2l, block_m=128, block_h=256))
    assert jnp.allclose(out_t, ref_l, atol=5e-3, rtol=5e-3), "tiled mismatch"

    # --- bf16 operand path (production MXU path; f32 accumulation inside) ---
    x_b = x_l.astype(jnp.bfloat16)
    out_b = jax.block_until_ready(
        feed_forward(x_b, w1l.astype(jnp.bfloat16), b1l.astype(jnp.bfloat16),
                     w2l.astype(jnp.bfloat16), b2l.astype(jnp.bfloat16)))
    ref_b = _reference(x_b.astype(jnp.float32), w1l, b1l, w2l, b2l)
    assert jnp.allclose(out_b.astype(jnp.float32), ref_b, atol=5e-2, rtol=5e-2), \
        "bf16 mismatch"

    print("KERNEL_OK")
</pallas_src>

<mosaic_0001>
module attributes {stable_mosaic.version = 11 : i64} {
  func.func @_ffn_fused_kernel(%arg0: i32, %arg1: memref<8x128xf32, #tpu.memory_space<vmem>>, %arg2: memref<128x128xf32, #tpu.memory_space<vmem>>, %arg3: memref<1x128xf32, #tpu.memory_space<vmem>>, %arg4: memref<128x128xf32, #tpu.memory_space<vmem>>, %arg5: memref<1x128xf32, #tpu.memory_space<vmem>>, %arg6: memref<8x128xf32, #tpu.memory_space<vmem>>) attributes {dimension_semantics = [#tpu.dimension_semantics<parallel>], iteration_bounds = array<i64: 2>, scalar_prefetch = 0 : i64, scratch_operands = 0 : i64, tpu.core_type = #tpu.core_type<tc>, window_params = [{transform_indices = @transform_0, window_bounds = array<i64: 8, 128>}, {pipeline_mode = #tpu.pipeline_mode<synchronous>, transform_indices = @transform_1, window_bounds = array<i64: 128, 128>}, {pipeline_mode = #tpu.pipeline_mode<synchronous>, transform_indices = @transform_2, window_bounds = array<i64: 1, 128>}, {pipeline_mode = #tpu.pipeline_mode<synchronous>, transform_indices = @transform_3, window_bounds = array<i64: 128, 128>}, {pipeline_mode = #tpu.pipeline_mode<synchronous>, transform_indices = @transform_4, window_bounds = array<i64: 1, 128>}, {transform_indices = @transform_5, window_bounds = array<i64: 8, 128>}]} {
    %c0 = arith.constant 0 : index
    %c0_0 = arith.constant 0 : index
    %0 = vector.load %arg1[%c0, %c0_0] : memref<8x128xf32, #tpu.memory_space<vmem>>, vector<8x128xf32>
    %c0_1 = arith.constant 0 : index
    %c0_2 = arith.constant 0 : index
    %1 = vector.load %arg2[%c0_1, %c0_2] : memref<128x128xf32, #tpu.memory_space<vmem>>, vector<128x128xf32>
    %cst = arith.constant dense<0.000000e+00> : vector<8x128xf32>
    %2 = tpu.matmul %0, %1, %cst {dimension_numbers = #tpu.dot_dimension_numbers<[1], [0], [0], [1], [0, 0, 1, 1], [], []>} : vector<8x128xf32>, vector<128x128xf32>, vector<8x128xf32> -> vector<8x128xf32>
    %c0_3 = arith.constant 0 : index
    %c0_4 = arith.constant 0 : index
    %3 = vector.load %arg3[%c0_3, %c0_4] : memref<1x128xf32, #tpu.memory_space<vmem>>, vector<1x128xf32>
    %4 = vector.broadcast %3 : vector<1x128xf32> to vector<8x128xf32>
    %5 = arith.addf %2, %4 : vector<8x128xf32>
    %cst_5 = arith.constant 0.000000e+00 : f32
    %6 = vector.broadcast %cst_5 : f32 to vector<8x128xf32>
    %7 = arith.maximumf %5, %6 : vector<8x128xf32>
    %c0_6 = arith.constant 0 : index
    %c0_7 = arith.constant 0 : index
    %8 = vector.load %arg4[%c0_6, %c0_7] : memref<128x128xf32, #tpu.memory_space<vmem>>, vector<128x128xf32>
    %cst_8 = arith.constant dense<0.000000e+00> : vector<8x128xf32>
    %9 = tpu.matmul %7, %8, %cst_8 {dimension_numbers = #tpu.dot_dimension_numbers<[1], [0], [0], [1], [0, 0, 1, 1], [], []>} : vector<8x128xf32>, vector<128x128xf32>, vector<8x128xf32> -> vector<8x128xf32>
    %c0_9 = arith.constant 0 : index
    %c0_10 = arith.constant 0 : index
    %10 = vector.load %arg5[%c0_9, %c0_10] : memref<1x128xf32, #tpu.memory_space<vmem>>, vector<1x128xf32>
    %11 = vector.broadcast %10 : vector<1x128xf32> to vector<8x128xf32>
    %12 = arith.addf %9, %11 : vector<8x128xf32>
    %c0_11 = arith.constant 0 : index
    %c0_12 = arith.constant 0 : index
    %13 = vector.load %arg6[%c0_11, %c0_12] : memref<8x128xf32, #tpu.memory_space<vmem>>, vector<8x128xf32>
    tpu.vector_store %arg6[%c0_11, %c0_12], %12 {strides = array<i32>} : memref<8x128xf32, #tpu.memory_space<vmem>>, vector<8x128xf32>,
    return
  }
  func.func @transform_0(%arg0: i32) -> (i32, i32) {
    %c0_i32 = arith.constant 0 : i32
    %c0_i32_0 = arith.constant 0 : i32
    return %arg0, %c0_i32 : i32, i32
  }
  func.func @transform_1(%arg0: i32) -> (i32, i32) {
    %c0_i32 = arith.constant 0 : i32
    %c0_i32_0 = arith.constant 0 : i32
    %c0_i32_1 = arith.constant 0 : i32
    return %c0_i32, %c0_i32_0 : i32, i32
  }
  func.func @transform_2(%arg0: i32) -> (i32, i32) {
    %c0_i32 = arith.constant 0 : i32
    %c0_i32_0 = arith.constant 0 : i32
    %c0_i32_1 = arith.constant 0 : i32
    return %c0_i32, %c0_i32_0 : i32, i32
  }
  func.func @transform_3(%arg0: i32) -> (i32, i32) {
    %c0_i32 = arith.constant 0 : i32
    %c0_i32_0 = arith.constant 0 : i32
    %c0_i32_1 = arith.constant 0 : i32
    return %c0_i32, %c0_i32_0 : i32, i32
  }
  func.func @transform_4(%arg0: i32) -> (i32, i32) {
    %c0_i32 = arith.constant 0 : i32
    %c0_i32_0 = arith.constant 0 : i32
    %c0_i32_1 = arith.constant 0 : i32
    return %c0_i32, %c0_i32_0 : i32, i32
  }
  func.func @transform_5(%arg0: i32) -> (i32, i32) {
    %c0_i32 = arith.constant 0 : i32
    %c0_i32_0 = arith.constant 0 : i32
    return %arg0, %c0_i32 : i32, i32
  }
}

</mosaic_0001>

<bundles_post_ra>
// kernel: feed_forward.1
= control target key start
LH: loop header
LB: loop body
LE: loop exit
PB: predicated region body
PF: predicated region fallthrough
CT: control target
= control target key end

     0   :  { %s677_s18 = smov 0   ;;  %s819_s0 = inlined_call_operand.vmem [shape: f32[16,128], index: 0, kind: input, shape index: {}]   ;;  %s820_s1 = inlined_call_operand.vmem [shape: f32[128,128], index: 1, kind: input, shape index: {}]   ;;  %s821_s2 = inlined_call_operand.vmem [shape: f32[1,128], index: 2, kind: input, shape index: {}]   ;;  %s822_s3 = inlined_call_operand.vmem [shape: f32[128,128], index: 3, kind: input, shape index: {}]   ;;  %s823_s4 = inlined_call_operand.vmem [shape: f32[1,128], index: 4, kind: input, shape index: {}]   ;;  %s824_s5 = inlined_call_operand.vmem [shape: f32[16,128], index: 5, kind: output, shape index: {}]  }
   0x1 LB: > { %s462_s19 = sadd.s32 4294967295, %s642_s18   ;;  %p466_p0 = scmp.ge.s32.totalorder %s642_s18, 1  ;;  %s642_s18 = sphi %s677_s18, %s15_s18  }
   0x2   : > { %p186_p1 = scmp.lt.s32.totalorder %s642_s18, 3 }
   0x4   : > { %p187_p2 = pnand %p466_p0, %p186_p1 }
   0x5   : > { %v221_v0 = vld [vmem:[%s820_s1] sm:$0xff] (!%p187_p2)  ;;  %v222_v1 = vld [vmem:[%s820_s1 + $0x8] sm:$0xff] (!%p187_p2)  ;;  %v223_v2 = vld [vmem:[%s820_s1 + $0x10] sm:$0xff] (!%p187_p2)  ;;  %v644_v3 = vmov (!%p187_p2), 0.0|0.0   ;;  %vm645_vm0 = vmmov (!%p187_p2), 0   ;;  %v646_v6 = vmov (!%p187_p2), 0.0  }
   0x6   : > { %190 = sbr.rel (%p187_p2) target bundleno = 470 (0x1d6), region = 40  ;;  %577 = vmatprep.subr.bf16.mxu0 (!%p187_p2), %v644_v3  ;;  %v578_v4 = vpack.c.bf16 (!%p187_p2), %v222_v1, %v221_v0  ;;  %v224_v5 = vld [vmem:[%s820_s1 + $0x18] sm:$0xff] (!%p187_p2)  ;;  %539 = vmatprep.mubr.msk.f32.mxu0 (!%p187_p2), %vm645_vm0, %v646_v6  ;;  %v225_v8 = vld [vmem:[%s820_s1 + $0x20] sm:$0xff] (!%p187_p2)  ;;  %v226_v9 = vld [vmem:[%s820_s1 + $0x28] sm:$0xff] (!%p187_p2)  ;;  %p212_p3 = scmp.lt.s32.totalorder (!%p187_p2), %s462_s19, 1 }
   0x7   : > { %601 = vmatprep.subr.bf16.mxu1 (!%p187_p2), %v644_v3  ;;  %574 = vmatprep.mubr.msk.f32.mxu1 (!%p187_p2), %vm645_vm0, %v646_v6  ;;  %v581_v7 = vpack.c.bf16 (!%p187_p2), %v224_v5, %v223_v2  ;;  %v315_v10 = vld [vmem:[%s822_s3] sm:$0xff] (!%p187_p2)  ;;  %v316_v11 = vld [vmem:[%s822_s3 + $0x8] sm:$0xff] (!%p187_p2)  ;;  %v317_v13 = vld [vmem:[%s822_s3 + $0x10] sm:$0xff] (!%p187_p2)  ;;  %v584_v15 = vpack.c.bf16 (!%p187_p2), %v226_v9, %v225_v8 }
   0x8   : > { %579 = vmatpush3.bf16.msra.mxu0 (!%p187_p2), %v578_v4  ;;  %v602_v12 = vpack.c.bf16 (!%p187_p2), %v316_v11, %v315_v10  ;;  %v318_v14 = vld [vmem:[%s822_s3 + $0x18] sm:$0xff] (!%p187_p2)  ;;  %v227_v16 = vld [vmem:[%s820_s1 + $0x30] sm:$0xff] (!%p187_p2)  ;;  %v319_v19 = vld [vmem:[%s822_s3 + $0x20] sm:$0xff] (!%p187_p2) }
   0x9   : > { %580 = vmatprep.subr.bf16.mxu0 (!%p187_p2), %v644_v3  ;;  %v228_v17 = vld [vmem:[%s820_s1 + $0x38] sm:$0xff] (!%p187_p2)  ;;  %v605_v18 = vpack.c.bf16 (!%p187_p2), %v318_v14, %v317_v13  ;;  %v320_v20 = vld [vmem:[%s822_s3 + $0x28] sm:$0xff] (!%p187_p2)  ;;  %v229_v22 = vld [vmem:[%s820_s1 + $0x40] sm:$0xff] (!%p187_p2) }
   0xa   : > { %603 = vmatpush3.bf16.msra.mxu1 (!%p187_p2), %v602_v12  ;;  %v587_v21 = vpack.c.bf16 (!%p187_p2), %v228_v17, %v227_v16  ;;  %v230_v23 = vld [vmem:[%s820_s1 + $0x48] sm:$0xff] (!%p187_p2)  ;;  %v608_v24 = vpack.c.bf16 (!%p187_p2), %v320_v20, %v319_v19  ;;  %v321_v25 = vld [vmem:[%s822_s3 + $0x30] sm:$0xff] (!%p187_p2)  ;;  %v322_v26 = vld [vmem:[%s822_s3 + $0x38] sm:$0xff] (!%p187_p2) }
   0xb   : > { %604 = vmatprep.subr.bf16.mxu1 (!%p187_p2), %v644_v3  ;;  %v590_v27 = vpack.c.bf16 (!%p187_p2), %v230_v23, %v229_v22  ;;  %v231_v28 = vld [vmem:[%s820_s1 + $0x50] sm:$0xff] (!%p187_p2)  ;;  %v232_v29 = vld [vmem:[%s820_s1 + $0x58] sm:$0xff] (!%p187_p2)  ;;  %v611_v30 = vpack.c.bf16 (!%p187_p2), %v322_v26, %v321_v25  ;;  %v323_v31 = vld [vmem:[%s822_s3 + $0x40] sm:$0xff] (!%p187_p2) }
   0xc   : > { %582 = vmatpush3.bf16.msra.mxu0 (!%p187_p2), %v581_v7  ;;  %v324_v32 = vld [vmem:[%s822_s3 + $0x48] sm:$0xff] (!%p187_p2)  ;;  %v593_v33 = vpack.c.bf16 (!%p187_p2), %v232_v29, %v231_v28  ;;  %v233_v34 = vld [vmem:[%s820_s1 + $0x60] sm:$0xff] (!%p187_p2)  ;;  %v325_v37 = vld [vmem:[%s822_s3 + $0x50] sm:$0xff] (!%p187_p2) }
   0xd   : > { %583 = vmatprep.subr.bf16.mxu0 %v644_v3  ;;  %v234_v35 = vld [vmem:[%s820_s1 + $0x68] sm:$0xff]  ;;  %v614_v36 = vpack.c.bf16 %v324_v32, %v323_v31  ;;  %s826_s19 = smov (!%p212_p3, %s462_s19), 1  ;;  %v326_v38 = vld [vmem:[%s822_s3 + $0x58] sm:$0xff]  ;;  %v235_v40 = vld [vmem:[%s820_s1 + $0x70] sm:$0xff] }
   0xe   : > { %606 = vmatpush3.bf16.msra.mxu1 %v605_v18  ;;  %v596_v39 = vpack.c.bf16 %v234_v35, %v233_v34  ;;  %v236_v41 = vld [vmem:[%s820_s1 + $0x78] sm:$0xff]  ;;  %v617_v42 = vpack.c.bf16 %v326_v38, %v325_v37  ;;  %s467_s30 = sshll.u32 %s826_s19, 3  ;;  %v327_v43 = vld [vmem:[%s822_s3 + $0x60] sm:$0xff]  ;;  %v328_v44 = vld [vmem:[%s822_s3 + $0x68] sm:$0xff] }
   0xf   : > { %607 = vmatprep.subr.bf16.mxu1 %v644_v3  ;;  %v599_v45 = vpack.c.bf16 %v236_v41, %v235_v40  ;;  %s215_s12 = scalar_lea.vmem %s819_s0, %s467_s30  ;;  %v620_v46 = vpack.c.bf16 %v328_v44, %v327_v43  ;;  %v329_v48 = vld [vmem:[%s822_s3 + $0x70] sm:$0xff]  ;;  %v330_v49 = vld [vmem:[%s822_s3 + $0x78] sm:$0xff]  ;;  %v469_v51 = vld [vmem:[%s821_s2] ss:$0 sm:$0xff]  ;;  %s219_s24 = scalar_lea.vmem %s824_s5, %s467_s30 }
  0x10   : > { %585 = vmatpush3.bf16.msra.mxu0 %v584_v15  ;;  %v220_v47 = vld [vmem:[%s215_s12] sm:$0xff]  ;;  %v623_v50 = vpack.c.bf16 %v330_v49, %v329_v48 }
  0x11   : > { %586 = vmatprep.subr.bf16.mxu0 %v644_v3  ;;  %v470_v56 = vld [vmem:[%s823_s4] ss:$0 sm:$0xff] }
  0x12   : > { %609 = vmatpush3.bf16.msra.mxu1 %v608_v24 }
  0x13   : > { %610 = vmatprep.subr.bf16.mxu1 %v644_v3 }
  0x14   : > { %588 = vmatpush3.bf16.msra.mxu0 %v587_v21 }
  0x15   : > { %589 = vmatprep.subr.bf16.mxu0 %v644_v3 }
  0x16   : > { %612 = vmatpush3.bf16.msra.mxu1 %v611_v30 }
  0x17   : > { %613 = vmatprep.subr.bf16.mxu1 %v644_v3 }
  0x18   : > { %591 = vmatpush3.bf16.msra.mxu0 %v590_v27 }
  0x19   : > { %592 = vmatprep.subr.bf16.mxu0 %v644_v3 }
  0x1a   : > { %615 = vmatpush3.bf16.msra.mxu1 %v614_v36 }
  0x1b   : > { %616 = vmatprep.subr.bf16.mxu1 %v644_v3 }
  0x1c   : > { %594 = vmatpush3.bf16.msra.mxu0 %v593_v33 }
  0x1d   : > { %595 = vmatprep.subr.bf16.mxu0 %v644_v3 }
  0x1e   : > { %618 = vmatpush3.bf16.msra.mxu1 %v617_v42 }
  0x1f   : > { %619 = vmatprep.subr.bf16.mxu1 %v644_v3 }
  0x20   : > { %597 = vmatpush3.bf16.msra.mxu0 %v596_v39 }
  0x21   : > { %598 = vmatprep.subr.bf16.mxu0 %v644_v3 }
  0x22   : > { %621 = vmatpush3.bf16.msra.mxu1 %v620_v46 }
  0x23   : > { %622 = vmatprep.subr.bf16.mxu1 %v644_v3 }
  0x24   : > { %600 = vmatpush3.bf16.msra.mxu0 %v599_v45 }
  0x26   : > { %624 = vmatpush3.bf16.msra.mxu1 %v623_v50 }
  0x27   : > { %540 = vmatmul.mubr.f32.vlgmr.msra.gmra.mrb[0].mxu0 %v220_v47 }
  0xfa   : > { %v310_v52 = vpop.f32.mrb[0].mxu0 }
  0xfb   : > { %v311_v53 = vadd.f32 %v469_v51, %v310_v52  ;;  %v541_v54 = vpop.f32.mrb[1].mxu0 }
  0xfd   : > { %v314_v55 = vmax.f32 %v311_v53, 0.0 }
  0xff   : > { %575 = vmatmul.mubr.f32.vlgmr.msra.gmra.mrb[0].mxu1 %v314_v55 }
 0x1d2   : > { %v404_v57 = vpop.f32.mrb[0].mxu1 }
 0x1d3   : > { %v405_v58 = vadd.f32 %v470_v56, %v404_v57  ;;  %v576_v59 = vpop.f32.mrb[1].mxu1 }
 0x1d5   : > { %408 = vst [vmem:[%s219_s24] sm:$0xff] %v405_v58 }
 0x1d6 PF: > { %s15_s18 = sadd.s32 1, %s642_s18  }
 0x1d7   : > { %p12_p4 = scmp.ge.s32.totalorder %s15_s18, 4  }
 0x1d9   :  { %14 = sbr.rel (!%p12_p4) target bundleno = 1 (0x1), region = 70 }

</bundles_post_ra>
